<compile_context>
chip_gen: v7x
topology: tpu7x:2x2x1
jax: 0.10.0
libtpu: 0.0.40
codegen_flags: <defaults>
</compile_context>

<pallas_src>
import numpy as np
import jax
import jax.numpy as jnp
from jax import lax
from jax.experimental import pallas as pl
from jax.experimental.pallas import tpu as pltpu

# Small-but-representative ViT config (reference model: image 224, patch 16, hidden 768).
BATCH = 2
NUM_CHANNELS = 4
IMAGE_SIZE = 32
PATCH_SIZE = 8
HIDDEN = 128                                        # multiple of 128 -> lane-dense
GRID_H = IMAGE_SIZE // PATCH_SIZE
NUM_PATCHES = GRID_H * GRID_H                       # 16 (multiple of 8 -> aligned sublanes)
SEQ = NUM_PATCHES + 1                               # 17 (CLS + patches)
S_PAD = 32                                          # SEQ padded to a multiple of 16 (bf16 tile)
PATCH_DIM = NUM_CHANNELS * PATCH_SIZE * PATCH_SIZE  # 256


# ----------------------------- Pallas kernel (fused) -----------------------------
def vit_embeddings_kernel(patches_ref, w_ref, pos_ref, out_ref):
    # patches_ref: (BT, S_PAD, K) bf16   row 0 = zero CLS slot, rows SEQ.. = zero padding
    # w_ref:       (K, D)         bf16   conv weight as a pre-transposed dense matrix
    # pos_ref:     (S_PAD, D)     f32    pos_emb with conv bias folded in; row 0 = cls+pos0
    # out_ref:     (BT, SEQ, D)   f32
    bt, sp, k = patches_ref.shape
    d = w_ref.shape[1]

    # One big lane-dense MXU matmul over all BT*S_PAD rows.  S_PAD is a multiple of the
    # bf16 sublane tile, so both reshapes are free layout no-ops.
    x = patches_ref[...].reshape(bt * sp, k)                              # (BT*S_PAD, K) bf16
    proj = jnp.dot(x, w_ref[...], preferred_element_type=jnp.float32)     # single bf16 pass, f32 acc
    tokens = proj.reshape(bt, sp, d) + pos_ref[...]                       # f32 epilogue (v5e-safe)

    # Store exactly the SEQ valid rows (CLS row comes from the zero patch row + pos_ref[0]).
    out_ref[...] = tokens[:, :out_ref.shape[1], :].astype(out_ref.dtype)
    # TODO(synk): nn.Dropout uses eval semantics (identity); training-mode dropout RNG,
    # bool_masked_pos/mask_token blending and bicubic interpolate_pos_encoding are not
    # implemented (default ViT forward path skips all of them).


# ----------------------------- wrappers -----------------------------
def _patchify(pixel_values):
    """(B, C, H, W) -> (B, num_patches, C*ph*pw); patch features ordered (c, kh, kw)
    to match Conv2d weight layout (D, C, kh, kw)."""
    B, C, H, W = pixel_values.shape
    ph = pw = PATCH_SIZE
    gh, gw = H // ph, W // pw
    x = pixel_values.reshape(B, C, gh, ph, gw, pw)
    x = x.transpose(0, 2, 4, 1, 3, 5)                 # (B, gh, gw, C, ph, pw)
    return x.reshape(B, gh * gw, C * ph * pw)


def prepare_params(conv_w, conv_b, cls_token, pos_emb):
    """One-time parameter prep, hoisted out of the per-call path.

    Returns:
      w_mat   (K, D) bf16 : conv weight reshaped + transposed for a dense matmul.
      pos_adj (S_PAD, D) f32 : position table with conv bias folded into patch rows and
                               the CLS token folded into row 0 (no bias on the CLS slot).
    """
    D = conv_w.shape[0]
    K = PATCH_DIM
    w_mat = jnp.asarray(conv_w.reshape(D, K).T, dtype=jnp.bfloat16)       # (K, D)
    pos = pos_emb.reshape(SEQ, D).astype(jnp.float32)
    pos_adj = jnp.zeros((S_PAD, D), jnp.float32)
    pos_adj = pos_adj.at[0, :].set(pos[0] + cls_token.reshape(D))          # CLS slot
    pos_adj = pos_adj.at[1:SEQ, :].set(pos[1:] + conv_b[None, :])          # bias folded in
    return w_mat, pos_adj


def vit_embeddings_forward(pixel_values, w_mat, pos_adj):
    """Equivalent of ViTEmbeddings.forward with bool_masked_pos=None,
    interpolate_pos_encoding=False (the default path), dropout in eval mode."""
    B = pixel_values.shape[0]
    D = w_mat.shape[1]
    K = PATCH_DIM

    # Patch extraction is a pure layout transform; cast to bf16 so the materialized
    # activation (and its DMA) is half-width.  The padded buffer is built with a single
    # dynamic_update_slice at row offset 1 (row 0 = CLS slot, rows SEQ..S_PAD-1 = padding)
    # instead of a separate full-tensor jnp.pad pass.
    patches = _patchify(pixel_values).astype(jnp.bfloat16)                 # (B, P, K)
    patches_pad = lax.dynamic_update_slice(
        jnp.zeros((B, S_PAD, K), jnp.bfloat16), patches, (0, 1, 0))        # (B, S_PAD, K)

    # Batch-block the grid: at this size one step holds the whole batch (single flattened
    # matmul); at production batch sizes keep each block's VMEM footprint in check
    # (v7x has 64 MiB VMEM / 32 MiB scoped default) and let "parallel" shard blocks.
    bt = B
    grid = (B // bt,)

    out = pl.pallas_call(
        vit_embeddings_kernel,
        out_shape=jax.ShapeDtypeStruct((B, SEQ, D), jnp.float32),
        grid_spec=pltpu.PrefetchScalarGridSpec(
            num_scalar_prefetch=0,
            grid=grid,
            in_specs=[
                pl.BlockSpec((bt, S_PAD, K), lambda b: (b, 0, 0)),   # batch block of patches
                pl.BlockSpec((K, D), lambda b: (0, 0)),              # shared pre-transposed weight
                pl.BlockSpec((S_PAD, D), lambda b: (0, 0)),          # pos (+bias, +CLS) table
            ],
            out_specs=pl.BlockSpec((bt, SEQ, D), lambda b: (b, 0, 0)),
        ),
        compiler_params=pltpu.CompilerParams(
            dimension_semantics=("parallel",)),   # whole-batch-block steps; trivial at grid=(1,)
    )(patches_pad, w_mat, pos_adj)
    return out


# ----------------------------- pure-JAX reference (f32, HIGHEST) -----------------------------
def reference_forward(pixel_values, conv_w, conv_b, cls_token, pos_emb):
    B = pixel_values.shape[0]
    D = conv_w.shape[0]
    patches = _patchify(pixel_values)
    proj = jnp.einsum('bpk,kd->bpd', patches, conv_w.reshape(D, -1).T,
                      precision=lax.Precision.HIGHEST) + conv_b
    cls = jnp.broadcast_to(cls_token.reshape(1, 1, D), (B, 1, D))
    emb = jnp.concatenate([cls, proj], axis=1)
    return emb + pos_emb.reshape(1, SEQ, D)


if __name__ == "__main__":
    key = jax.random.PRNGKey(0)
    ks = jax.random.split(key, 5)
    pixel_values = jax.random.normal(
        ks[0], (BATCH, NUM_CHANNELS, IMAGE_SIZE, IMAGE_SIZE), jnp.float32)
    conv_w = jax.random.normal(
        ks[1], (HIDDEN, NUM_CHANNELS, PATCH_SIZE, PATCH_SIZE), jnp.float32) * 0.02
    conv_b = jax.random.normal(ks[2], (HIDDEN,), jnp.float32) * 0.02
    cls_token = jax.random.normal(ks[3], (1, 1, HIDDEN), jnp.float32)
    pos_emb = jax.random.normal(ks[4], (1, SEQ, HIDDEN), jnp.float32)

    # One-time parameter preparation (weight transpose, bias/CLS fold) — outside the
    # per-call jitted path.
    w_mat, pos_adj = prepare_params(conv_w, conv_b, cls_token, pos_emb)

    fwd = jax.jit(vit_embeddings_forward)
    out = jax.block_until_ready(fwd(pixel_values, w_mat, pos_adj))
    ref = jax.block_until_ready(
        reference_forward(pixel_values, conv_w, conv_b, cls_token, pos_emb))

    assert out.shape == (BATCH, SEQ, HIDDEN) and out.dtype == jnp.float32
    # Kernel uses bf16 matmul operands with f32 accumulation; tolerance reflects bf16
    # input rounding against the pure-f32 HIGHEST reference.
    np.testing.assert_allclose(np.asarray(out), np.asarray(ref), rtol=2e-2, atol=2e-2)
    print("KERNEL_OK")
</pallas_src>

<mosaic_0001>
module attributes {stable_mosaic.version = 11 : i64} {
  func.func @vit_embeddings_kernel(%arg0: i32, %arg1: memref<2x32x256xbf16, #tpu.memory_space<vmem>>, %arg2: memref<256x128xbf16, #tpu.memory_space<vmem>>, %arg3: memref<32x128xf32, #tpu.memory_space<vmem>>, %arg4: memref<2x17x128xf32, #tpu.memory_space<vmem>>) attributes {dimension_semantics = [#tpu.dimension_semantics<parallel>], iteration_bounds = array<i64: 1>, scalar_prefetch = 0 : i64, scratch_operands = 0 : i64, tpu.core_type = #tpu.core_type<tc>, window_params = [{transform_indices = @transform_0, window_bounds = array<i64: 2, 32, 256>}, {pipeline_mode = #tpu.pipeline_mode<synchronous>, transform_indices = @transform_1, window_bounds = array<i64: 256, 128>}, {pipeline_mode = #tpu.pipeline_mode<synchronous>, transform_indices = @transform_2, window_bounds = array<i64: 32, 128>}, {transform_indices = @transform_3, window_bounds = array<i64: 2, 17, 128>}]} {
    %c0 = arith.constant 0 : index
    %c0_0 = arith.constant 0 : index
    %c0_1 = arith.constant 0 : index
    %0 = vector.load %arg1[%c0, %c0_0, %c0_1] : memref<2x32x256xbf16, #tpu.memory_space<vmem>>, vector<2x32x256xbf16>
    %1 = vector.shape_cast %0 : vector<2x32x256xbf16> to vector<64x256xbf16>
    %c0_2 = arith.constant 0 : index
    %c0_3 = arith.constant 0 : index
    %2 = vector.load %arg2[%c0_2, %c0_3] : memref<256x128xbf16, #tpu.memory_space<vmem>>, vector<256x128xbf16>
    %cst = arith.constant dense<0.000000e+00> : vector<64x128xf32>
    %3 = tpu.matmul %1, %2, %cst {dimension_numbers = #tpu.dot_dimension_numbers<[1], [0], [0], [1], [0, 0, 1, 1], [], []>} : vector<64x256xbf16>, vector<256x128xbf16>, vector<64x128xf32> -> vector<64x128xf32>
    %4 = vector.shape_cast %3 : vector<64x128xf32> to vector<2x32x128xf32>
    %c0_4 = arith.constant 0 : index
    %c0_5 = arith.constant 0 : index
    %5 = vector.load %arg3[%c0_4, %c0_5] : memref<32x128xf32, #tpu.memory_space<vmem>>, vector<32x128xf32>
    %6 = vector.shape_cast %5 : vector<32x128xf32> to vector<1x32x128xf32>
    %7 = vector.broadcast %6 : vector<1x32x128xf32> to vector<2x32x128xf32>
    %8 = arith.addf %4, %7 : vector<2x32x128xf32>
    %9 = vector.extract_strided_slice %8 {offsets = [0, 0, 0], sizes = [2, 17, 128], strides = [1, 1, 1]} : vector<2x32x128xf32> to vector<2x17x128xf32>
    %c0_6 = arith.constant 0 : index
    %c0_7 = arith.constant 0 : index
    %c0_8 = arith.constant 0 : index
    %10 = vector.load %arg4[%c0_6, %c0_7, %c0_8] : memref<2x17x128xf32, #tpu.memory_space<vmem>>, vector<2x17x128xf32>
    tpu.vector_store %arg4[%c0_6, %c0_7, %c0_8], %9 {strides = array<i32>} : memref<2x17x128xf32, #tpu.memory_space<vmem>>, vector<2x17x128xf32>,
    return
  }
  func.func @transform_0(%arg0: i32) -> (i32, i32, i32) {
    %c0_i32 = arith.constant 0 : i32
    %c0_i32_0 = arith.constant 0 : i32
    %c0_i32_1 = arith.constant 0 : i32
    return %arg0, %c0_i32, %c0_i32_0 : i32, i32, i32
  }
  func.func @transform_1(%arg0: i32) -> (i32, i32) {
    %c0_i32 = arith.constant 0 : i32
    %c0_i32_0 = arith.constant 0 : i32
    %c0_i32_1 = arith.constant 0 : i32
    return %c0_i32, %c0_i32_0 : i32, i32
  }
  func.func @transform_2(%arg0: i32) -> (i32, i32) {
    %c0_i32 = arith.constant 0 : i32
    %c0_i32_0 = arith.constant 0 : i32
    %c0_i32_1 = arith.constant 0 : i32
    return %c0_i32, %c0_i32_0 : i32, i32
  }
  func.func @transform_3(%arg0: i32) -> (i32, i32, i32) {
    %c0_i32 = arith.constant 0 : i32
    %c0_i32_0 = arith.constant 0 : i32
    %c0_i32_1 = arith.constant 0 : i32
    return %arg0, %c0_i32, %c0_i32_0 : i32, i32, i32
  }
}

</mosaic_0001>

<bundles_post_ra>
// kernel: vit_embeddings_forward.1
= control target key start
LH: loop header
LB: loop body
LE: loop exit
PB: predicated region body
PF: predicated region fallthrough
CT: control target
= control target key end

     0   :  { %s500_s1 = inlined_call_operand.vmem [shape: bf16[256,128], index: 1, kind: input, shape index: {}]   ;;  %s501_s0 = inlined_call_operand.vmem [shape: bf16[2,32,256], index: 0, kind: input, shape index: {}]   ;;  %s502_s2 = inlined_call_operand.vmem [shape: f32[32,128], index: 2, kind: input, shape index: {}]   ;;  %s503_s3 = inlined_call_operand.vmem [shape: f32[2,17,128], index: 3, kind: output, shape index: {}]  }
   0x1   :  { %v353_v0 = vld [vmem:[%s500_s1 + $0x40] sm:$0xff]   ;;  %v355_v2 = vld [vmem:[%s500_s1 + $0x48] sm:$0xff]   ;;  %v357_v4 = vld [vmem:[%s500_s1 + $0x50] sm:$0xff]  }
   0x2   :  { %v354_v1 = vld [vmem:[%s500_s1] sm:$0xff]   ;;  %297 = vmatprep.subr.bf16.mxu0 %v353_v0  ;;  %337 = vmatprep.subr.bf16.mxu1 %v353_v0  ;;  %v356_v3 = vld [vmem:[%s500_s1 + $0x8] sm:$0xff]   ;;  %v358_v5 = vld [vmem:[%s500_s1 + $0x10] sm:$0xff]  }
   0x3   :  { %298 = vmatpush3.bf16.msra.mxu0 %v354_v1  ;;  %345 = vmatpush3.bf16.msra.mxu1 %v354_v1  ;;  %v359_v6 = vld [vmem:[%s500_s1 + $0x58] sm:$0xff]   ;;  %v361_v8 = vld [vmem:[%s500_s1 + $0x60] sm:$0xff]   ;;  %v363_v10 = vld [vmem:[%s500_s1 + $0x68] sm:$0xff]  }
   0x4   :  { %299 = vmatprep.subr.bf16.mxu0 %v355_v2  ;;  %338 = vmatprep.subr.bf16.mxu1 %v355_v2  ;;  %v360_v7 = vld [vmem:[%s500_s1 + $0x18] sm:$0xff]   ;;  %v362_v9 = vld [vmem:[%s500_s1 + $0x20] sm:$0xff]   ;;  %v364_v13 = vld [vmem:[%s500_s1 + $0x28] sm:$0xff]  }
   0x5   :  { %v371_v11 = vld [vmem:[%s501_s0 + $0x4] ss:$8 sps:$4 sm:$0xff]   ;;  %v365_v14 = vld [vmem:[%s500_s1 + $0x70] sm:$0xff]   ;;  %v367_v16 = vld [vmem:[%s500_s1 + $0x78] sm:$0xff]  }
   0x6   :  { %v374_v12 = vld [vmem:[%s501_s0 + $0x24] ss:$8 sps:$4 sm:$0xff]   ;;  %223 = vmatprep.mubr.bf16.mxu0 %v371_v11  ;;  %v366_v15 = vld [vmem:[%s500_s1 + $0x30] sm:$0xff]   ;;  %v368_v17 = vld [vmem:[%s500_s1 + $0x38] sm:$0xff]  }
   0x7   :  { %300 = vmatpush3.bf16.msra.mxu0 %v356_v3  ;;  %346 = vmatpush3.bf16.msra.mxu1 %v356_v3  ;;  %v369_v18 = vld [vmem:[%s501_s0] ss:$8 sps:$4 sm:$0xff]   ;;  %v375_v20 = vld [vmem:[%s501_s0 + $0x14] ss:$8 sps:$4 sm:$0xff]   ;;  %v379_v22 = vld [vmem:[%s501_s0 + $0x10] ss:$8 sps:$4 sm:$0xff]  }
   0x8   :  { %301 = vmatprep.subr.bf16.mxu0 %v357_v4  ;;  %339 = vmatprep.subr.bf16.mxu1 %v357_v4  ;;  %v372_v19 = vld [vmem:[%s501_s0 + $0x20] ss:$8 sps:$4 sm:$0xff]   ;;  %v377_v21 = vld [vmem:[%s501_s0 + $0x34] ss:$8 sps:$4 sm:$0xff]   ;;  %v380_v23 = vld [vmem:[%s501_s0 + $0x30] ss:$8 sps:$4 sm:$0xff]  }
   0x9   :  { %238 = vmatprep.mubr.bf16.mxu1 %v374_v12  ;;  %v254_v27 = vld [vmem:[%s502_s2] sm:$0xff]  ;;  %v255_v34 = vld [vmem:[%s502_s2 + $0x8] sm:$0xff]  ;;  %v256_v45 = vld [vmem:[%s502_s2 + $0x10] sm:$0xff] }
   0xb   :  { %302 = vmatpush3.bf16.msra.mxu0 %v358_v5  ;;  %347 = vmatpush3.bf16.msra.mxu1 %v358_v5 }
   0xc   :  { %303 = vmatprep.subr.bf16.mxu0 %v359_v6  ;;  %340 = vmatprep.subr.bf16.mxu1 %v359_v6 }
   0xf   :  { %304 = vmatpush3.bf16.msra.mxu0 %v360_v7  ;;  %348 = vmatpush3.bf16.msra.mxu1 %v360_v7 }
  0x10   :  { %305 = vmatprep.subr.bf16.mxu0 %v361_v8  ;;  %341 = vmatprep.subr.bf16.mxu1 %v361_v8 }
  0x13   :  { %306 = vmatpush3.bf16.msra.mxu0 %v362_v9  ;;  %349 = vmatpush3.bf16.msra.mxu1 %v362_v9 }
  0x14   :  { %307 = vmatprep.subr.bf16.mxu0 %v363_v10  ;;  %342 = vmatprep.subr.bf16.mxu1 %v363_v10 }
  0x17   :  { %308 = vmatpush3.bf16.msra.mxu0 %v364_v13  ;;  %350 = vmatpush3.bf16.msra.mxu1 %v364_v13 }
  0x18   :  { %309 = vmatprep.subr.bf16.mxu0 %v365_v14  ;;  %343 = vmatprep.subr.bf16.mxu1 %v365_v14 }
  0x1b   :  { %310 = vmatpush3.bf16.msra.mxu0 %v366_v15  ;;  %351 = vmatpush3.bf16.msra.mxu1 %v366_v15 }
  0x1c   :  { %311 = vmatprep.subr.bf16.mxu0 %v367_v16  ;;  %344 = vmatprep.subr.bf16.mxu1 %v367_v16 }
  0x1f   :  { %312 = vmatpush3.bf16.msra.mxu0 %v368_v17  ;;  %352 = vmatpush3.bf16.msra.mxu1 %v368_v17 }
  0x22   :  { %224 = vmatmul.mubr.bf16.vlgmr.msra.gmra.mrb[0].mxu0 %v369_v18  ;;  %239 = vmatmul.mubr.bf16.vlgmr.msra.gmra.mrb[0].mxu1 %v372_v19 }
  0x23   :  { %231 = vmatprep.mubr.bf16.mxu0 %v375_v20  ;;  %246 = vmatprep.mubr.bf16.mxu1 %v377_v21 }
  0x2a   :  { %232 = vmatmul.mubr.bf16.gmra.mrb[4].mxu0 %v379_v22  ;;  %247 = vmatmul.mubr.bf16.gmra.mrb[4].mxu1 %v380_v23 }
  0xf5   :  { %v313_v24 = vpop.f32.mrb[0].mxu0  ;;  %v325_v25 = vpop.f32.mrb[0].mxu1 }
  0xf6   :  { %v314_v26 = vpop.f32.mrb[1].mxu0  ;;  %v326_v28 = vpop.f32.mrb[1].mxu1 }
  0xf7   :  { %v315_v29 = vadd.f32 %v314_v26, %v313_v24  ;;  %v327_v30 = vadd.f32 %v326_v28, %v325_v25  ;;  %v316_v31 = vpop.f32.mrb[2].mxu0  ;;  %v328_v32 = vpop.f32.mrb[2].mxu1 }
  0xf8   :  { %v317_v33 = vpop.f32.mrb[3].mxu0  ;;  %v329_v35 = vpop.f32.mrb[3].mxu1 }
  0xf9   :  { %v257_v36 = vadd.f32 %v315_v29, %v254_v27  ;;  %v260_v37 = vadd.f32 %v327_v30, %v254_v27  ;;  %v318_v38 = vadd.f32 %v317_v33, %v316_v31  ;;  %v330_v39 = vadd.f32 %v329_v35, %v328_v32 }
  0xfb   :  { %263 = vst [vmem:[%s503_s3] sm:$0xff] %v257_v36  ;;  %266 = vst [vmem:[%s503_s3 + $0x18] sm:$0xff] %v260_v37  ;;  %v258_v40 = vadd.f32 %v318_v38, %v255_v34  ;;  %v261_v41 = vadd.f32 %v330_v39, %v255_v34 }
  0xfd   :  { %264 = vst [vmem:[%s503_s3 + $0x8] sm:$0xff] %v258_v40  ;;  %267 = vst [vmem:[%s503_s3 + $0x20] sm:$0xff] %v261_v41  ;;  %v319_v42 = vpop.f32.mrb[4].mxu0  ;;  %v331_v43 = vpop.f32.mrb[4].mxu1 }
  0xfe   :  { %v320_v44 = vpop.f32.mrb[5].mxu0  ;;  %v332_v46 = vpop.f32.mrb[5].mxu1 }
  0xff   :  { %v321_v47 = vadd.f32 %v320_v44, %v319_v42  ;;  %v333_v48 = vadd.f32 %v332_v46, %v331_v43  ;;  %v322_v49 = vpop.f32.mrb[6].mxu0  ;;  %v334_v50 = vpop.f32.mrb[6].mxu1 }
 0x100   :  { %v323_v51 = vpop.f32.mrb[7].mxu0  ;;  %v335_v52 = vpop.f32.mrb[7].mxu1 }
 0x101   :  { %v259_v53 = vadd.f32 %v321_v47, %v256_v45  ;;  %v262_v54 = vadd.f32 %v333_v48, %v256_v45 }
 0x103   :  { %265 = vst [vmem:[%s503_s3 + $0x10] sm:$0x1] %v259_v53  ;;  %268 = vst [vmem:[%s503_s3 + $0x28] sm:$0x1] %v262_v54 }

</bundles_post_ra>
